<compile_context>
chip_gen: v6e
topology: v6e:2x2x1
jax: 0.10.0
libtpu: 0.0.40
codegen_flags: <defaults>
</compile_context>

<pallas_src>
import jax
import jax.numpy as jnp
from jax.experimental import pallas as pl
from jax.experimental.pallas import tpu as pltpu


def _round_up(x, m):
    return (x + m - 1) // m * m


def rnn_kernel(x_ref, wih_ref, whh_ref, brnn_ref, wfc_ref, bfc_ref, out_ref, p_ref):
    # x_ref   : (S*Bp, E)   time-major embedded inputs (flattened over time/batch)
    # wih_ref : (E, Hp)     W_ih^T (pre-transposed, zero-padded)
    # whh_ref : (Hp, Hp)    W_hh^T (pre-transposed, zero-padded)
    # brnn_ref: (1, Hp)     b_ih + b_hh (zero-padded)
    # wfc_ref : (Hp, Vp)    W_fc^T (pre-transposed, zero-padded)
    # bfc_ref : (1, Vp)     b_fc (zero-padded)
    # out_ref : (Bp, Vp)    logits for the last timestep
    # p_ref   : (S*Bp, Hp)  VMEM scratch for the hoisted input projection
    sb, _ = x_ref.shape
    bp = out_ref.shape[0]
    hp = whh_ref.shape[0]
    seq_len = sb // bp

    # Hoisted input projection: one large MXU matmul, bias folded in once
    # (removed from the serial per-step loop entirely).
    p_ref[...] = (
        jnp.dot(x_ref[...], wih_ref[...], preferred_element_type=jnp.float32)
        + brnn_ref[...]
    )

    w_hh = whh_ref[...]  # hoist the weight load out of the loop

    def step(t, h):
        row = pl.multiple_of(t * bp, bp)
        p_t = p_ref[pl.ds(row, bp), :]
        return jnp.tanh(
            jnp.dot(h, w_hh, preferred_element_type=jnp.float32) + p_t
        )

    h_last = jax.lax.fori_loop(
        0, seq_len, step, jnp.zeros((bp, hp), jnp.float32), unroll=True
    )

    # fc(out[:, -1, :]) fused into the epilogue; (Bp, Vp) is lane-dense.
    out_ref[...] = (
        jnp.dot(h_last, wfc_ref[...], preferred_element_type=jnp.float32)
        + bfc_ref[...]
    ).astype(out_ref.dtype)


def rnn_model_forward(token_ids, emb_table, w_ih, w_hh, b_rnn, w_fc, b_fc):
    """token_ids: (batch, seq) int32.  Returns logits (batch, vocab) f32."""
    B, S = token_ids.shape
    E = emb_table.shape[1]
    H = w_ih.shape[1]
    V = w_fc.shape[1]

    # Sublane/lane-dense padded shapes.
    Bp = _round_up(max(B, 8), 8)
    Hp = _round_up(H, 128)
    Vp = _round_up(V, 128)

    # Time-major embedding gather (no separate activation transpose op).
    # TODO(synk): the gather itself stays as an XLA op (data-dependent indexing).
    x_seq = jnp.take(emb_table, token_ids.T, axis=0).astype(jnp.float32)  # (S, B, E)
    x_seq = jnp.pad(x_seq, ((0, 0), (0, Bp - B), (0, 0)))                 # (S, Bp, E)
    x_flat = x_seq.reshape(S * Bp, E)

    w_ih_p = jnp.pad(w_ih.astype(jnp.float32), ((0, 0), (0, Hp - H)))
    w_hh_p = jnp.pad(w_hh.astype(jnp.float32), ((0, Hp - H), (0, Hp - H)))
    b_rnn_p = jnp.pad(b_rnn.astype(jnp.float32), ((0, 0), (0, Hp - H)))
    w_fc_p = jnp.pad(w_fc.astype(jnp.float32), ((0, Hp - H), (0, Vp - V)))
    b_fc_p = jnp.pad(b_fc.astype(jnp.float32), ((0, 0), (0, Vp - V)))

    grid_spec = pltpu.PrefetchScalarGridSpec(
        num_scalar_prefetch=0,
        grid=(1,),  # single invocation: recurrence lives inside the kernel
        in_specs=[
            pl.BlockSpec((S * Bp, E), lambda i: (0, 0)),   # embedded inputs
            pl.BlockSpec((E, Hp), lambda i: (0, 0)),       # W_ih^T
            pl.BlockSpec((Hp, Hp), lambda i: (0, 0)),      # W_hh^T
            pl.BlockSpec((1, Hp), lambda i: (0, 0)),       # b_ih + b_hh
            pl.BlockSpec((Hp, Vp), lambda i: (0, 0)),      # W_fc^T
            pl.BlockSpec((1, Vp), lambda i: (0, 0)),       # b_fc
        ],
        out_specs=pl.BlockSpec((Bp, Vp), lambda i: (0, 0)),
        scratch_shapes=[pltpu.VMEM((S * Bp, Hp), jnp.float32)],
    )

    out_padded = pl.pallas_call(
        rnn_kernel,
        out_shape=jax.ShapeDtypeStruct((Bp, Vp), jnp.float32),
        grid_spec=grid_spec,
        compiler_params=pltpu.CompilerParams(
            dimension_semantics=("arbitrary",),
        ),
    )(x_flat, w_ih_p, w_hh_p, b_rnn_p, w_fc_p, b_fc_p)

    return out_padded[:B, :V]


def reference_forward(token_ids, emb_table, w_ih, w_hh, b_rnn, w_fc, b_fc):
    """Pure-JAX reference of the same forward pass (for sanity check)."""
    x = jnp.take(emb_table, token_ids, axis=0).astype(jnp.float32)  # (B, S, E)
    B, S, _ = x.shape
    H = w_ih.shape[1]
    h = jnp.zeros((B, H), jnp.float32)
    for t in range(S):
        h = jnp.tanh(x[:, t, :] @ w_ih + h @ w_hh + b_rnn)
    return h @ w_fc + b_fc


if __name__ == "__main__":
    # Small shapes consistent with the module.
    vocab_size = 64
    emb_dim = 16
    hid_dim = 32
    batch = 2
    seq = 8

    key = jax.random.PRNGKey(0)
    k_emb, k_wih, k_whh, k_bih, k_bhh, k_wfc, k_bfc, k_tok = jax.random.split(key, 8)

    # Deterministic parameter init (shapes match nn.Embedding / nn.RNN / nn.Linear).
    emb_table = jax.random.normal(k_emb, (vocab_size, emb_dim), jnp.float32)
    bound = 1.0 / jnp.sqrt(hid_dim)
    # RNN/Linear weights stored pre-transposed so the kernel does x @ W directly.
    w_ih = jax.random.uniform(k_wih, (emb_dim, hid_dim), jnp.float32, -bound, bound)
    w_hh = jax.random.uniform(k_whh, (hid_dim, hid_dim), jnp.float32, -bound, bound)
    b_ih = jax.random.uniform(k_bih, (1, hid_dim), jnp.float32, -bound, bound)
    b_hh = jax.random.uniform(k_bhh, (1, hid_dim), jnp.float32, -bound, bound)
    b_rnn = b_ih + b_hh
    w_fc = jax.random.uniform(k_wfc, (hid_dim, vocab_size), jnp.float32, -bound, bound)
    b_fc = jax.random.uniform(k_bfc, (1, vocab_size), jnp.float32, -bound, bound)

    token_ids = jax.random.randint(k_tok, (batch, seq), 0, vocab_size, jnp.int32)

    logits = rnn_model_forward(token_ids, emb_table, w_ih, w_hh, b_rnn, w_fc, b_fc)
    logits = jax.block_until_ready(logits)

    ref = reference_forward(token_ids, emb_table, w_ih, w_hh, b_rnn, w_fc, b_fc)
    assert logits.shape == (batch, vocab_size)
    assert jnp.allclose(logits, ref, atol=1e-4, rtol=1e-4), "mismatch vs reference"

    print("KERNEL_OK")
</pallas_src>

<mosaic_0001>
module attributes {stable_mosaic.version = 11 : i64} {
  func.func @rnn_kernel(%arg0: i32, %arg1: memref<64x16xf32, #tpu.memory_space<vmem>>, %arg2: memref<16x128xf32, #tpu.memory_space<vmem>>, %arg3: memref<128x128xf32, #tpu.memory_space<vmem>>, %arg4: memref<1x128xf32, #tpu.memory_space<vmem>>, %arg5: memref<128x128xf32, #tpu.memory_space<vmem>>, %arg6: memref<1x128xf32, #tpu.memory_space<vmem>>, %arg7: memref<8x128xf32, #tpu.memory_space<vmem>>, %arg8: memref<64x128xf32, #tpu.memory_space<vmem>>) attributes {dimension_semantics = [#tpu.dimension_semantics<arbitrary>], iteration_bounds = array<i64: 1>, scalar_prefetch = 0 : i64, scratch_operands = 1 : i64, tpu.core_type = #tpu.core_type<tc>, window_params = [{pipeline_mode = #tpu.pipeline_mode<synchronous>, transform_indices = @transform_0, window_bounds = array<i64: 64, 16>}, {pipeline_mode = #tpu.pipeline_mode<synchronous>, transform_indices = @transform_1, window_bounds = array<i64: 16, 128>}, {pipeline_mode = #tpu.pipeline_mode<synchronous>, transform_indices = @transform_2, window_bounds = array<i64: 128, 128>}, {pipeline_mode = #tpu.pipeline_mode<synchronous>, transform_indices = @transform_3, window_bounds = array<i64: 1, 128>}, {pipeline_mode = #tpu.pipeline_mode<synchronous>, transform_indices = @transform_4, window_bounds = array<i64: 128, 128>}, {pipeline_mode = #tpu.pipeline_mode<synchronous>, transform_indices = @transform_5, window_bounds = array<i64: 1, 128>}, {pipeline_mode = #tpu.pipeline_mode<synchronous>, transform_indices = @transform_6, window_bounds = array<i64: 8, 128>}]} {
    %c0 = arith.constant 0 : index
    %c0_0 = arith.constant 0 : index
    %0 = vector.load %arg1[%c0, %c0_0] : memref<64x16xf32, #tpu.memory_space<vmem>>, vector<64x16xf32>
    %c0_1 = arith.constant 0 : index
    %c0_2 = arith.constant 0 : index
    %1 = vector.load %arg2[%c0_1, %c0_2] : memref<16x128xf32, #tpu.memory_space<vmem>>, vector<16x128xf32>
    %cst = arith.constant dense<0.000000e+00> : vector<64x128xf32>
    %2 = tpu.matmul %0, %1, %cst {dimension_numbers = #tpu.dot_dimension_numbers<[1], [0], [0], [1], [0, 0, 1, 1], [], []>} : vector<64x16xf32>, vector<16x128xf32>, vector<64x128xf32> -> vector<64x128xf32>
    %c0_3 = arith.constant 0 : index
    %c0_4 = arith.constant 0 : index
    %3 = vector.load %arg4[%c0_3, %c0_4] : memref<1x128xf32, #tpu.memory_space<vmem>>, vector<1x128xf32>
    %4 = vector.broadcast %3 : vector<1x128xf32> to vector<64x128xf32>
    %5 = arith.addf %2, %4 : vector<64x128xf32>
    %c0_5 = arith.constant 0 : index
    %c0_6 = arith.constant 0 : index
    %6 = vector.load %arg8[%c0_5, %c0_6] : memref<64x128xf32, #tpu.memory_space<vmem>>, vector<64x128xf32>
    tpu.vector_store %arg8[%c0_5, %c0_6], %5 {strides = array<i32>} : memref<64x128xf32, #tpu.memory_space<vmem>>, vector<64x128xf32>,
    %c0_7 = arith.constant 0 : index
    %c0_8 = arith.constant 0 : index
    %7 = vector.load %arg3[%c0_7, %c0_8] : memref<128x128xf32, #tpu.memory_space<vmem>>, vector<128x128xf32>
    %cst_9 = arith.constant 0.000000e+00 : f32
    %8 = vector.broadcast %cst_9 : f32 to vector<8x128xf32>
    %c0_i32 = arith.constant 0 : i32
    %c8_i32 = arith.constant 8 : i32
    %9 = arith.muli %c0_i32, %c8_i32 : i32
    %10 = tpu.assume_multiple %9, 8 : i32
    %11 = arith.index_cast %10 : i32 to index
    %c0_10 = arith.constant 0 : index
    %12 = vector.load %arg8[%11, %c0_10] : memref<64x128xf32, #tpu.memory_space<vmem>>, vector<8x128xf32>
    %cst_11 = arith.constant dense<0.000000e+00> : vector<8x128xf32>
    %13 = tpu.matmul %8, %7, %cst_11 {dimension_numbers = #tpu.dot_dimension_numbers<[1], [0], [0], [1], [0, 0, 1, 1], [], []>} : vector<8x128xf32>, vector<128x128xf32>, vector<8x128xf32> -> vector<8x128xf32>
    %14 = arith.addf %13, %12 : vector<8x128xf32>
    %15 = math.tanh %14 : vector<8x128xf32>
    %c1_i32 = arith.constant 1 : i32
    %c8_i32_12 = arith.constant 8 : i32
    %16 = arith.muli %c1_i32, %c8_i32_12 : i32
    %17 = tpu.assume_multiple %16, 8 : i32
    %18 = arith.index_cast %17 : i32 to index
    %c0_13 = arith.constant 0 : index
    %19 = vector.load %arg8[%18, %c0_13] : memref<64x128xf32, #tpu.memory_space<vmem>>, vector<8x128xf32>
    %cst_14 = arith.constant dense<0.000000e+00> : vector<8x128xf32>
    %20 = tpu.matmul %15, %7, %cst_14 {dimension_numbers = #tpu.dot_dimension_numbers<[1], [0], [0], [1], [0, 0, 1, 1], [], []>} : vector<8x128xf32>, vector<128x128xf32>, vector<8x128xf32> -> vector<8x128xf32>
    %21 = arith.addf %20, %19 : vector<8x128xf32>
    %22 = math.tanh %21 : vector<8x128xf32>
    %c2_i32 = arith.constant 2 : i32
    %c8_i32_15 = arith.constant 8 : i32
    %23 = arith.muli %c2_i32, %c8_i32_15 : i32
    %24 = tpu.assume_multiple %23, 8 : i32
    %25 = arith.index_cast %24 : i32 to index
    %c0_16 = arith.constant 0 : index
    %26 = vector.load %arg8[%25, %c0_16] : memref<64x128xf32, #tpu.memory_space<vmem>>, vector<8x128xf32>
    %cst_17 = arith.constant dense<0.000000e+00> : vector<8x128xf32>
    %27 = tpu.matmul %22, %7, %cst_17 {dimension_numbers = #tpu.dot_dimension_numbers<[1], [0], [0], [1], [0, 0, 1, 1], [], []>} : vector<8x128xf32>, vector<128x128xf32>, vector<8x128xf32> -> vector<8x128xf32>
    %28 = arith.addf %27, %26 : vector<8x128xf32>
    %29 = math.tanh %28 : vector<8x128xf32>
    %c3_i32 = arith.constant 3 : i32
    %c8_i32_18 = arith.constant 8 : i32
    %30 = arith.muli %c3_i32, %c8_i32_18 : i32
    %31 = tpu.assume_multiple %30, 8 : i32
    %32 = arith.index_cast %31 : i32 to index
    %c0_19 = arith.constant 0 : index
    %33 = vector.load %arg8[%32, %c0_19] : memref<64x128xf32, #tpu.memory_space<vmem>>, vector<8x128xf32>
    %cst_20 = arith.constant dense<0.000000e+00> : vector<8x128xf32>
    %34 = tpu.matmul %29, %7, %cst_20 {dimension_numbers = #tpu.dot_dimension_numbers<[1], [0], [0], [1], [0, 0, 1, 1], [], []>} : vector<8x128xf32>, vector<128x128xf32>, vector<8x128xf32> -> vector<8x128xf32>
    %35 = arith.addf %34, %33 : vector<8x128xf32>
    %36 = math.tanh %35 : vector<8x128xf32>
    %c4_i32 = arith.constant 4 : i32
    %c8_i32_21 = arith.constant 8 : i32
    %37 = arith.muli %c4_i32, %c8_i32_21 : i32
    %38 = tpu.assume_multiple %37, 8 : i32
    %39 = arith.index_cast %38 : i32 to index
    %c0_22 = arith.constant 0 : index
    %40 = vector.load %arg8[%39, %c0_22] : memref<64x128xf32, #tpu.memory_space<vmem>>, vector<8x128xf32>
    %cst_23 = arith.constant dense<0.000000e+00> : vector<8x128xf32>
    %41 = tpu.matmul %36, %7, %cst_23 {dimension_numbers = #tpu.dot_dimension_numbers<[1], [0], [0], [1], [0, 0, 1, 1], [], []>} : vector<8x128xf32>, vector<128x128xf32>, vector<8x128xf32> -> vector<8x128xf32>
    %42 = arith.addf %41, %40 : vector<8x128xf32>
    %43 = math.tanh %42 : vector<8x128xf32>
    %c5_i32 = arith.constant 5 : i32
    %c8_i32_24 = arith.constant 8 : i32
    %44 = arith.muli %c5_i32, %c8_i32_24 : i32
    %45 = tpu.assume_multiple %44, 8 : i32
    %46 = arith.index_cast %45 : i32 to index
    %c0_25 = arith.constant 0 : index
    %47 = vector.load %arg8[%46, %c0_25] : memref<64x128xf32, #tpu.memory_space<vmem>>, vector<8x128xf32>
    %cst_26 = arith.constant dense<0.000000e+00> : vector<8x128xf32>
    %48 = tpu.matmul %43, %7, %cst_26 {dimension_numbers = #tpu.dot_dimension_numbers<[1], [0], [0], [1], [0, 0, 1, 1], [], []>} : vector<8x128xf32>, vector<128x128xf32>, vector<8x128xf32> -> vector<8x128xf32>
    %49 = arith.addf %48, %47 : vector<8x128xf32>
    %50 = math.tanh %49 : vector<8x128xf32>
    %c6_i32 = arith.constant 6 : i32
    %c8_i32_27 = arith.constant 8 : i32
    %51 = arith.muli %c6_i32, %c8_i32_27 : i32
    %52 = tpu.assume_multiple %51, 8 : i32
    %53 = arith.index_cast %52 : i32 to index
    %c0_28 = arith.constant 0 : index
    %54 = vector.load %arg8[%53, %c0_28] : memref<64x128xf32, #tpu.memory_space<vmem>>, vector<8x128xf32>
    %cst_29 = arith.constant dense<0.000000e+00> : vector<8x128xf32>
    %55 = tpu.matmul %50, %7, %cst_29 {dimension_numbers = #tpu.dot_dimension_numbers<[1], [0], [0], [1], [0, 0, 1, 1], [], []>} : vector<8x128xf32>, vector<128x128xf32>, vector<8x128xf32> -> vector<8x128xf32>
    %56 = arith.addf %55, %54 : vector<8x128xf32>
    %57 = math.tanh %56 : vector<8x128xf32>
    %c7_i32 = arith.constant 7 : i32
    %c8_i32_30 = arith.constant 8 : i32
    %58 = arith.muli %c7_i32, %c8_i32_30 : i32
    %59 = tpu.assume_multiple %58, 8 : i32
    %60 = arith.index_cast %59 : i32 to index
    %c0_31 = arith.constant 0 : index
    %61 = vector.load %arg8[%60, %c0_31] : memref<64x128xf32, #tpu.memory_space<vmem>>, vector<8x128xf32>
    %cst_32 = arith.constant dense<0.000000e+00> : vector<8x128xf32>
    %62 = tpu.matmul %57, %7, %cst_32 {dimension_numbers = #tpu.dot_dimension_numbers<[1], [0], [0], [1], [0, 0, 1, 1], [], []>} : vector<8x128xf32>, vector<128x128xf32>, vector<8x128xf32> -> vector<8x128xf32>
    %63 = arith.addf %62, %61 : vector<8x128xf32>
    %64 = math.tanh %63 : vector<8x128xf32>
    %c8_i32_33 = arith.constant 8 : i32
    %c0_34 = arith.constant 0 : index
    %c0_35 = arith.constant 0 : index
    %65 = vector.load %arg5[%c0_34, %c0_35] : memref<128x128xf32, #tpu.memory_space<vmem>>, vector<128x128xf32>
    %cst_36 = arith.constant dense<0.000000e+00> : vector<8x128xf32>
    %66 = tpu.matmul %64, %65, %cst_36 {dimension_numbers = #tpu.dot_dimension_numbers<[1], [0], [0], [1], [0, 0, 1, 1], [], []>} : vector<8x128xf32>, vector<128x128xf32>, vector<8x128xf32> -> vector<8x128xf32>
    %c0_37 = arith.constant 0 : index
    %c0_38 = arith.constant 0 : index
    %67 = vector.load %arg6[%c0_37, %c0_38] : memref<1x128xf32, #tpu.memory_space<vmem>>, vector<1x128xf32>
    %68 = vector.broadcast %67 : vector<1x128xf32> to vector<8x128xf32>
    %69 = arith.addf %66, %68 : vector<8x128xf32>
    %c0_39 = arith.constant 0 : index
    %c0_40 = arith.constant 0 : index
    %70 = vector.load %arg7[%c0_39, %c0_40] : memref<8x128xf32, #tpu.memory_space<vmem>>, vector<8x128xf32>
    tpu.vector_store %arg7[%c0_39, %c0_40], %69 {strides = array<i32>} : memref<8x128xf32, #tpu.memory_space<vmem>>, vector<8x128xf32>,
    return
  }
  func.func @transform_0(%arg0: i32) -> (i32, i32) {
    %c0_i32 = arith.constant 0 : i32
    %c0_i32_0 = arith.constant 0 : i32
    %c0_i32_1 = arith.constant 0 : i32
    return %c0_i32, %c0_i32_0 : i32, i32
  }
  func.func @transform_1(%arg0: i32) -> (i32, i32) {
    %c0_i32 = arith.constant 0 : i32
    %c0_i32_0 = arith.constant 0 : i32
    %c0_i32_1 = arith.constant 0 : i32
    return %c0_i32, %c0_i32_0 : i32, i32
  }
  func.func @transform_2(%arg0: i32) -> (i32, i32) {
    %c0_i32 = arith.constant 0 : i32
    %c0_i32_0 = arith.constant 0 : i32
    %c0_i32_1 = arith.constant 0 : i32
    return %c0_i32, %c0_i32_0 : i32, i32
  }
  func.func @transform_3(%arg0: i32) -> (i32, i32) {
    %c0_i32 = arith.constant 0 : i32
    %c0_i32_0 = arith.constant 0 : i32
    %c0_i32_1 = arith.constant 0 : i32
    return %c0_i32, %c0_i32_0 : i32, i32
  }
  func.func @transform_4(%arg0: i32) -> (i32, i32) {
    %c0_i32 = arith.constant 0 : i32
    %c0_i32_0 = arith.constant 0 : i32
    %c0_i32_1 = arith.constant 0 : i32
    return %c0_i32, %c0_i32_0 : i32, i32
  }
  func.func @transform_5(%arg0: i32) -> (i32, i32) {
    %c0_i32 = arith.constant 0 : i32
    %c0_i32_0 = arith.constant 0 : i32
    %c0_i32_1 = arith.constant 0 : i32
    return %c0_i32, %c0_i32_0 : i32, i32
  }
  func.func @transform_6(%arg0: i32) -> (i32, i32) {
    %c0_i32 = arith.constant 0 : i32
    %c0_i32_0 = arith.constant 0 : i32
    %c0_i32_1 = arith.constant 0 : i32
    return %c0_i32, %c0_i32_0 : i32, i32
  }
}

</mosaic_0001>

<bundles_post_ra>
// kernel: tpu_custom_call.1
= control target key start
LH: loop header
LB: loop body
LE: loop exit
PB: predicated region body
PF: predicated region fallthrough
CT: control target
= control target key end

     0   :  { %11 = vsyncpa [#allocation4], 0  ;;  %s1952_s0 = inlined_call_operand.vmem [shape: f32[64,16], index: 0, kind: input, shape index: {}]   ;;  %s1953_s1 = inlined_call_operand.vmem [shape: f32[16,128], index: 1, kind: input, shape index: {}]   ;;  %s1954_s2 = inlined_call_operand.hbm [shape: f32[128,128], index: 2, kind: input, shape index: {}]   ;;  %s1955_s3 = inlined_call_operand.vmem [shape: f32[1,128], index: 3, kind: input, shape index: {}]   ;;  %s1956_s4 = inlined_call_operand.hbm [shape: f32[128,128], index: 4, kind: input, shape index: {}]   ;;  %s1957_s5 = inlined_call_operand.vmem [shape: f32[1,128], index: 5, kind: input, shape index: {}]   ;;  %s1958_s6 = inlined_call_operand.hbm [shape: f32[8,128], index: 6, kind: output, shape index: {}]  }
   0x1   :  { %12 = vsyncpa [#allocation7], 0 }
   0x2   :  { %13 = vsyncpa [#allocation5], 0  ;;  %s1509_s21 = smov [#allocation3]  }
   0x3   :  { %s23_s22 = sshll.u32 %s1509_s21, 4  ;;  %s24_s22 = int_to_ptr.vmem [resolvable:$true] %s23_s22 }
   0x4   :  { %s1451_s23 = scalar_lea.vmem %s24_s22, 2048  ;;  %p1456_p1 = scmp.lt.s32.totalorder %s24_s22, %s24_s22 }
   0x5   :  { %p1452_p0 = scmp.ne.s32.totalorder %s24_s22, %s1451_s23  ;;  %p1457_p2 = scmp.lt.s32.totalorder %s1451_s23, %s1451_s23 }
   0x7   :  { %p1458_p3 = por %p1457_p2, %p1456_p1 }
   0x9   :  { %p1459_p4 = pnand %p1458_p3, %p1452_p0 }
   0xb   :  { %1462 = shalt.err (!%p1459_p4)
}
   0xc   :  { %s1510_s24 = smov 128   ;;  %s1511_s25 = smov 8  }
   0xd   :  { %29 = dma.hbm_to_vmem [thread:$0]  %s1954_s2, 2048, %s24_s22, [#allocation4], %s1510_s24, %s1510_s24, %s1511_s25  }
   0xe   :  { %s1512_s28 = smov [#allocation6]  }
   0xf   :  { %s37_s29 = sshll.u32 %s1512_s28, 4  ;;  %s38_s29 = int_to_ptr.vmem [resolvable:$true] %s37_s29 }
  0x10   :  { %s1471_s30 = scalar_lea.vmem %s38_s29, 2048  ;;  %p1476_p6 = scmp.lt.s32.totalorder %s38_s29, %s38_s29 }
  0x11   :  { %p1472_p5 = scmp.ne.s32.totalorder %s38_s29, %s1471_s30  ;;  %p1477_p7 = scmp.lt.s32.totalorder %s1471_s30, %s1471_s30 }
  0x13   :  { %p1478_p8 = por %p1477_p7, %p1476_p6 }
  0x15   :  { %p1479_p9 = pnand %p1478_p8, %p1472_p5 }
  0x17   :  { %1482 = shalt.err (!%p1479_p9)
}
  0x18   :  { %43 = dma.hbm_to_vmem [thread:$0]  %s1956_s4, 2048, %s38_s29, [#allocation7], %s1510_s24, %s1510_s24, %s1511_s25  }
  0x19   :  { %1503 = dma.done.wait [#allocation4], 2048  }
  0x1a   :  { %1504 = vsyncadd [#allocation4], 4294965248 }
  0x1b   :  { %1505 = dma.done.wait [#allocation7], 2048  }
  0x1c   :  { %1506 = vsyncadd [#allocation7], 4294965248  ;;  %v1513_v0 = vmov 0.0   ;;  %vm1514_vm0 = vmmov 0   ;;  %v1560_v1 = vld [vmem:[#allocation3 + $0x78] sm:$0xff]  ;;  %v1562_v2 = vld [vmem:[#allocation3 + $0x70] sm:$0xff] }
  0x1d   :  { %1105 = vmatprep.subr.mxu1 %v1513_v0  ;;  %1137 = vmatprep.mubr.msk.f32.mxu1 %vm1514_vm0, %v1513_v0  ;;  %v1566_v3 = vld [vmem:[#allocation3 + $0x68] sm:$0xff]  ;;  %v1573_v5 = vld [vmem:[#allocation3 + $0x60] sm:$0xff]  ;;  %vm69_vm1 = vcmask 130048   ;;  %v1583_v8 = vld [vmem:[#allocation3 + $0x58] sm:$0xff]  ;;  %s1515_s28 = smov [#allocation8]  }
  0x1e   :  { %1106 = vmatpush3.msra.mxu1 %v1560_v1  ;;  %v61_v4 = vld [vmem:[%s1953_s1 + $0x8] sm:$0xff]  ;;  %v60_v6 = vld [vmem:[%s1953_s1] sm:$0xff]  ;;  %v1590_v10 = vld [vmem:[#allocation3 + $0x50] sm:$0xff]  ;;  %s906_s29 = sshll.u32 %s1515_s28, 4  ;;  %s907_s29 = int_to_ptr.vmem [resolvable:$true] %s906_s29 }
  0x1f   :  { %1107 = vmatprep.subr.mxu1 %v1513_v0  ;;  %1089 = vmatprep.subr.mxu0 %v61_v4  ;;  %v52_v7 = vld [vmem:[%s1952_s0] sm:$0xff]  ;;  %v53_v9 = vld [vmem:[%s1952_s0 + $0x8] sm:$0xff]  ;;  %v1608_v13 = vld [vmem:[#allocation3 + $0x38] sm:$0xff]  ;;  %s1483_s30 = scalar_lea.vmem %s907_s29, 128  ;;  %p1488_p11 = scmp.lt.s32.totalorder %s907_s29, %s907_s29 }
  0x20   :  { %1108 = vmatpush3.msra.mxu1 %v1562_v2  ;;  %1090 = vmatpush3.msra.mxu0 %v61_v4  ;;  %v1596_v11 = vld [vmem:[#allocation3 + $0x48] sm:$0xff]  ;;  %v1602_v12 = vld [vmem:[#allocation3 + $0x40] sm:$0xff]  ;;  %v1614_v14 = vld [vmem:[#allocation3 + $0x30] sm:$0xff]  ;;  %p1484_p10 = scmp.ne.s32.totalorder %s907_s29, %s1483_s30  ;;  %p1489_p12 = scmp.lt.s32.totalorder %s1483_s30, %s1483_s30 }
  0x21   :  { %1109 = vmatprep.subr.mxu1 %v1513_v0  ;;  %1091 = vmatprep.subr.mxu0 %v60_v6  ;;  %v1620_v15 = vld [vmem:[#allocation3 + $0x28] sm:$0xff]  ;;  %v1626_v16 = vld [vmem:[#allocation3 + $0x20] sm:$0xff]  ;;  %v1632_v17 = vld [vmem:[#allocation3 + $0x18] sm:$0xff] }
  0x22   :  { %1110 = vmatpush3.msra.mxu1 %v1566_v3  ;;  %1092 = vmatpush3.msra.mxu0 %v60_v6  ;;  %v1638_v18 = vld [vmem:[#allocation3 + $0x10] sm:$0xff]  ;;  %v1644_v19 = vld [vmem:[#allocation3 + $0x8] sm:$0xff]  ;;  %v1650_v20 = vld [vmem:[#allocation3] sm:$0xff]  ;;  %p1490_p13 = por %p1489_p12, %p1488_p11 }
  0x23   :  { %1111 = vmatprep.subr.mxu1 %v1513_v0  ;;  %1093 = vmatprep.mubr.msk.f32.mxu0 %vm69_vm1, %v52_v7  ;;  %v54_v21 = vld [vmem:[%s1952_s0 + $0x10] sm:$0xff]  ;;  %v55_v22 = vld [vmem:[%s1952_s0 + $0x18] sm:$0xff]  ;;  %v56_v23 = vld [vmem:[%s1952_s0 + $0x20] sm:$0xff] }
  0x24   :  { %1112 = vmatpush3.msra.mxu1 %v1573_v5  ;;  %1094 = vmatmul.mubr.msk.f32.vlgmr.msra.gmra.mxu0 %vm69_vm1, %v53_v9  ;;  %v57_v24 = vld [vmem:[%s1952_s0 + $0x28] sm:$0xff]  ;;  %v58_v25 = vld [vmem:[%s1952_s0 + $0x30] sm:$0xff]  ;;  %v59_v26 = vld [vmem:[%s1952_s0 + $0x38] sm:$0xff]  ;;  %p1491_p0 = pnand %p1490_p13, %p1484_p10 }
  0x25   :  { %1113 = vmatprep.subr.mxu1 %v1513_v0  ;;  %1140 = vmatprep.subr.mxu0 %v1513_v0  ;;  %v1735_v28 = vld [vmem:[%s1955_s3] ss:$0 sm:$0xff]  ;;  %v820_v4 = vld [vmem:[#allocation6 + $0x70] sm:$0xff]  ;;  %v817_v7 = vld [vmem:[#allocation6 + $0x58] sm:$0xff] }
  0x26   :  { %1114 = vmatpush3.msra.mxu1 %v1583_v8  ;;  %1141 = vmatpush3.msra.mxu0 %v1560_v1  ;;  %v818_v6 = vld [vmem:[#allocation6 + $0x60] sm:$0xff]  ;;  %v815_v9 = vld [vmem:[#allocation6 + $0x48] sm:$0xff] }
  0x27   :  { %1115 = vmatprep.subr.mxu1 %v1513_v0  ;;  %1142 = vmatprep.subr.mxu0 %v1513_v0 }
  0x28   :  { %1116 = vmatpush3.msra.mxu1 %v1590_v10  ;;  %1143 = vmatpush3.msra.mxu0 %v1562_v2 }
  0x29   :  { %1117 = vmatprep.subr.mxu1 %v1513_v0  ;;  %1144 = vmatprep.subr.mxu0 %v1513_v0 }
  0x2a   :  { %1118 = vmatpush3.msra.mxu1 %v1596_v11  ;;  %1145 = vmatpush3.msra.mxu0 %v1566_v3 }
  0x2b   :  { %1119 = vmatprep.subr.mxu1 %v1513_v0  ;;  %1146 = vmatprep.subr.mxu0 %v1513_v0 }
  0x2c   :  { %1120 = vmatpush3.msra.mxu1 %v1602_v12  ;;  %1147 = vmatpush3.msra.mxu0 %v1573_v5 }
  0x2d   :  { %1121 = vmatprep.subr.mxu1 %v1513_v0  ;;  %1148 = vmatprep.subr.mxu0 %v1513_v0 }
  0x2e   :  { %1122 = vmatpush3.msra.mxu1 %v1608_v13  ;;  %1149 = vmatpush3.msra.mxu0 %v1583_v8 }
  0x2f   :  { %1123 = vmatprep.subr.mxu1 %v1513_v0  ;;  %1150 = vmatprep.subr.mxu0 %v1513_v0 }
  0x30   :  { %1124 = vmatpush3.msra.mxu1 %v1614_v14  ;;  %1151 = vmatpush3.msra.mxu0 %v1590_v10 }
  0x31   :  { %1125 = vmatprep.subr.mxu1 %v1513_v0  ;;  %1152 = vmatprep.subr.mxu0 %v1513_v0 }
  0x32   :  { %1126 = vmatpush3.msra.mxu1 %v1620_v15  ;;  %1153 = vmatpush3.msra.mxu0 %v1596_v11 }
  0x33   :  { %1127 = vmatprep.subr.mxu1 %v1513_v0  ;;  %1154 = vmatprep.subr.mxu0 %v1513_v0 }
  0x34   :  { %1128 = vmatpush3.msra.mxu1 %v1626_v16  ;;  %1155 = vmatpush3.msra.mxu0 %v1602_v12 }
  0x35   :  { %1129 = vmatprep.subr.mxu1 %v1513_v0  ;;  %1156 = vmatprep.subr.mxu0 %v1513_v0 }
  0x36   :  { %1130 = vmatpush3.msra.mxu1 %v1632_v17  ;;  %1157 = vmatpush3.msra.mxu0 %v1608_v13 }
  0x37   :  { %1131 = vmatprep.subr.mxu1 %v1513_v0  ;;  %1158 = vmatprep.subr.mxu0 %v1513_v0 }
  0x38   :  { %1132 = vmatpush3.msra.mxu1 %v1638_v18  ;;  %1159 = vmatpush3.msra.mxu0 %v1614_v14 }
  0x39   :  { %1133 = vmatprep.subr.mxu1 %v1513_v0  ;;  %1160 = vmatprep.subr.mxu0 %v1513_v0 }
  0x3a   :  { %1134 = vmatpush3.msra.mxu1 %v1644_v19  ;;  %1161 = vmatpush3.msra.mxu0 %v1620_v15 }
  0x3b   :  { %1135 = vmatprep.subr.mxu1 %v1513_v0  ;;  %1162 = vmatprep.subr.mxu0 %v1513_v0 }
  0x3c   :  { %1136 = vmatpush3.msra.mxu1 %v1650_v20  ;;  %1163 = vmatpush3.msra.mxu0 %v1626_v16 }
  0x3d   :  { %1138 = vmatmul.mubr.f32.vlgmr.msra.gmra.mxu1 %v1513_v0  ;;  %1175 = vmatprep.subr.mxu1 %v1513_v0 }
  0x3e   :  { %1164 = vmatprep.subr.mxu0 %v1513_v0  ;;  %1176 = vmatpush3.msra.mxu1 %v1560_v1 }
  0x3f   :  { %1165 = vmatpush3.msra.mxu0 %v1632_v17  ;;  %1177 = vmatprep.subr.mxu1 %v1513_v0 }
  0x40   :  { %1166 = vmatprep.subr.mxu0 %v1513_v0  ;;  %1178 = vmatpush3.msra.mxu1 %v1562_v2 }
  0x41   :  { %1167 = vmatpush3.msra.mxu0 %v1638_v18  ;;  %1179 = vmatprep.subr.mxu1 %v1513_v0 }
  0x42   :  { %1168 = vmatprep.subr.mxu0 %v1513_v0  ;;  %1180 = vmatpush3.msra.mxu1 %v1566_v3 }
  0x43   :  { %1169 = vmatpush3.msra.mxu0 %v1644_v19  ;;  %1181 = vmatprep.subr.mxu1 %v1513_v0 }
  0x44   :  { %1170 = vmatprep.subr.mxu0 %v1513_v0  ;;  %1182 = vmatpush3.msra.mxu1 %v1573_v5 }
  0x45   :  { %1171 = vmatpush3.msra.mxu0 %v1650_v20  ;;  %1183 = vmatprep.subr.mxu1 %v1513_v0 }
  0x46   :  { %1184 = vmatpush3.msra.mxu1 %v1583_v8  ;;  %1207 = vmatprep.mubr.msk.f32.mxu1 %vm1514_vm0, %v1513_v0 }
  0x47   :  { %1185 = vmatprep.subr.mxu1 %v1513_v0  ;;  %1210 = vmatprep.subr.mxu0 %v1513_v0 }
  0x48   :  { %1186 = vmatpush3.msra.mxu1 %v1590_v10  ;;  %1096 = vmatprep.mubr.msk.f32.mxu0 %vm69_vm1, %v54_v21  ;;  %v808_v21 = vld [vmem:[#allocation6 + $0x10] sm:$0xff] }
  0x49   :  { %1187 = vmatprep.subr.mxu1 %v1513_v0  ;;  %1097 = vmatmul.mubr.msk.f32.gmra.mxu0 %vm69_vm1, %v55_v22  ;;  %v807_v22 = vld [vmem:[#allocation6 + $0x8] sm:$0xff] }
  0x4a   :  { %1188 = vmatpush3.msra.mxu1 %v1596_v11  ;;  %1099 = vmatprep.mubr.msk.f32.mxu0 %vm69_vm1, %v56_v23  ;;  %v806_v23 = vld [vmem:[#allocation6] sm:$0xff] }
  0x4b   :  { %1189 = vmatprep.subr.mxu1 %v1513_v0 }
  0x4c   :  { %1190 = vmatpush3.msra.mxu1 %v1602_v12 }
  0x4d   :  { %1191 = vmatprep.subr.mxu1 %v1513_v0  ;;  %1100 = vmatmul.mubr.msk.f32.gmra.mxu0 %vm69_vm1, %v57_v24 }
  0x4e   :  { %1192 = vmatpush3.msra.mxu1 %v1608_v13  ;;  %1102 = vmatprep.mubr.msk.f32.mxu0 %vm69_vm1, %v58_v25 }
  0x4f   :  { %1193 = vmatprep.subr.mxu1 %v1513_v0 }
  0x50   :  { %1194 = vmatpush3.msra.mxu1 %v1614_v14 }
  0x51   :  { %1195 = vmatprep.subr.mxu1 %v1513_v0  ;;  %1103 = vmatmul.mubr.msk.f32.gmra.mxu0 %vm69_vm1, %v59_v26 }
  0x52   :  { %1196 = vmatpush3.msra.mxu1 %v1620_v15  ;;  %1172 = vmatprep.mubr.msk.f32.mxu0 %vm1514_vm0, %v1513_v0 }
  0x53   :  { %1197 = vmatprep.subr.mxu1 %v1513_v0 }
  0x54   :  { %1198 = vmatpush3.msra.mxu1 %v1626_v16 }
  0x55   :  { %1199 = vmatprep.subr.mxu1 %v1513_v0 }
  0x56   :  { %1200 = vmatpush3.msra.mxu1 %v1632_v17 }
  0x57   :  { %1201 = vmatprep.subr.mxu1 %v1513_v0 }
  0x58   :  { %1202 = vmatpush3.msra.mxu1 %v1638_v18 }
  0x59   :  { %1203 = vmatprep.subr.mxu1 %v1513_v0 }
  0x5a   :  { %1204 = vmatpush3.msra.mxu1 %v1644_v19 }
  0x5b   :  { %1205 = vmatprep.subr.mxu1 %v1513_v0 }
  0x5c   :  { %1206 = vmatpush3.msra.mxu1 %v1650_v20 }
  0x5d   :  { %1245 = vmatprep.subr.mxu1 %v1513_v0 }
  0xe4   :  { %v1095_v27 = vpop.f32.mrf.mxu0 }
  0xe5   :  { %v166_v41 = vadd.f32 %v1095_v27, %v1735_v28 }
  0xe6   :  { %v160_v29 = vpop.f32.mrf.mxu0 }
  0xe7   :  { %v161_v30 = vadd.f32 %v1735_v28, %v160_v29 }
  0xfd   :  { %v290_v31 = vpop.f32.mrf.mxu1 }
  0xfe   :  { %v291_v32 = vadd.f32 %v290_v31, %v161_v30  ;;  %v925_v30 = vld [vmem:[%s1957_s5] ss:$0 sm:$0xff] }
  0xff   :  { %v1139_v33 = vpop.f32.mrf.mxu1 }
 0x100   :  { %1427 = vtanh.f32 %v291_v32 }
 0x109   :  { %v1772_v35 = vpop.f32.mrf.mxu0 }
 0x10a   :  { %v176_v51 = vadd.f32 %v1772_v35, %v1735_v28 }
 0x10b   :  { %v170_v36 = vpop.f32.mrf.mxu0 }
 0x10c   :  { %v171_v46 = vadd.f32 %v1735_v28, %v170_v36 }
 0x10d   :  { %v1428_v34 = vpop.eup %1427  ;;  %v1774_v37 = vpop.f32.mrf.mxu0 }
 0x10e   :  { %1173 = vmatmul.mubr.f32.vlgmr.msra.gmra.mxu0 %v1428_v34  ;;  %v186_v61 = vadd.f32 %v1774_v37, %v1735_v28 }
 0x10f   :  { %1211 = vmatpush3.msra.mxu0 %v1560_v1  ;;  %1242 = vmatprep.mubr.msk.f32.mxu0 %vm1514_vm0, %v1513_v0  ;;  %v1776_v38 = vpop.f32.mrf.mxu0 }
 0x110   :  { %1212 = vmatprep.subr.mxu0 %v1513_v0  ;;  %v181_v56 = vadd.f32 %v1735_v28, %v1776_v38 }
 0x111   :  { %1213 = vmatpush3.msra.mxu0 %v1562_v2  ;;  %v1778_v39 = vpop.f32.mrf.mxu0 }
 0x112   :  { %1214 = vmatprep.subr.mxu0 %v1513_v0  ;;  %v196_v24 = vadd.f32 %v1778_v39, %v1735_v28 }
 0x113   :  { %1215 = vmatpush3.msra.mxu0 %v1566_v3  ;;  %v1780_v40 = vpop.f32.mrf.mxu0 }
 0x114   :  { %1216 = vmatprep.subr.mxu0 %v1513_v0 }
 0x115   :  { %1217 = vmatpush3.msra.mxu0 %v1573_v5 }
 0x116   :  { %1218 = vmatprep.subr.mxu0 %v1513_v0 }
 0x117   :  { %1219 = vmatpush3.msra.mxu0 %v1583_v8 }
 0x118   :  { %1220 = vmatprep.subr.mxu0 %v1513_v0 }
 0x119   :  { %1221 = vmatpush3.msra.mxu0 %v1590_v10 }
 0x11a   :  { %1222 = vmatprep.subr.mxu0 %v1513_v0 }
 0x11b   :  { %1223 = vmatpush3.msra.mxu0 %v1596_v11 }
 0x11c   :  { %1224 = vmatprep.subr.mxu0 %v1513_v0 }
 0x11d   :  { %1225 = vmatpush3.msra.mxu0 %v1602_v12 }
 0x11e   :  { %1226 = vmatprep.subr.mxu0 %v1513_v0 }
 0x11f   :  { %1227 = vmatpush3.msra.mxu0 %v1608_v13 }
 0x120   :  { %1228 = vmatprep.subr.mxu0 %v1513_v0 }
 0x121   :  { %1229 = vmatpush3.msra.mxu0 %v1614_v14 }
 0x122   :  { %1230 = vmatprep.subr.mxu0 %v1513_v0 }
 0x123   :  { %1231 = vmatpush3.msra.mxu0 %v1620_v15 }
 0x124   :  { %1232 = vmatprep.subr.mxu0 %v1513_v0 }
 0x125   :  { %1233 = vmatpush3.msra.mxu0 %v1626_v16 }
 0x126   :  { %1234 = vmatprep.subr.mxu0 %v1513_v0 }
 0x127   :  { %1235 = vmatpush3.msra.mxu0 %v1632_v17 }
 0x128   :  { %1236 = vmatprep.subr.mxu0 %v1513_v0 }
 0x129   :  { %1237 = vmatpush3.msra.mxu0 %v1638_v18 }
 0x12a   :  { %1238 = vmatprep.subr.mxu0 %v1513_v0 }
 0x12b   :  { %1239 = vmatpush3.msra.mxu0 %v1644_v19 }
 0x12c   :  { %1240 = vmatprep.subr.mxu0 %v1513_v0 }
 0x12d   :  { %1241 = vmatpush3.msra.mxu0 %v1650_v20 }
 0x12e   :  { %1280 = vmatprep.subr.mxu0 %v1513_v0 }
 0x1ce   :  { %v363_v42 = vpop.f32.mrf.mxu0 }
 0x1cf   :  { %v364_v43 = vadd.f32 %v363_v42, %v166_v41 }
 0x1d0   :  { %v1174_v44 = vpop.f32.mrf.mxu0 }
 0x1d1   :  { %1429 = vtanh.f32 %v364_v43 }
 0x1de   :  { %v1430_v45 = vpop.eup %1429 }
 0x1df   :  { %1208 = vmatmul.mubr.f32.vlgmr.msra.gmra.mxu1 %v1430_v45 }
 0x1e0   :  { %1246 = vmatpush3.msra.mxu1 %v1560_v1  ;;  %1277 = vmatprep.mubr.msk.f32.mxu1 %vm1514_vm0, %v1513_v0 }
 0x1e1   :  { %1247 = vmatprep.subr.mxu1 %v1513_v0 }
 0x1e2   :  { %1248 = vmatpush3.msra.mxu1 %v1562_v2 }
 0x1e3   :  { %1249 = vmatprep.subr.mxu1 %v1513_v0 }
 0x1e4   :  { %1250 = vmatpush3.msra.mxu1 %v1566_v3 }
 0x1e5   :  { %1251 = vmatprep.subr.mxu1 %v1513_v0 }
 0x1e6   :  { %1252 = vmatpush3.msra.mxu1 %v1573_v5 }
 0x1e7   :  { %1253 = vmatprep.subr.mxu1 %v1513_v0 }
 0x1e8   :  { %1254 = vmatpush3.msra.mxu1 %v1583_v8 }
 0x1e9   :  { %1255 = vmatprep.subr.mxu1 %v1513_v0 }
 0x1ea   :  { %1256 = vmatpush3.msra.mxu1 %v1590_v10 }
 0x1eb   :  { %1257 = vmatprep.subr.mxu1 %v1513_v0 }
 0x1ec   :  { %1258 = vmatpush3.msra.mxu1 %v1596_v11 }
 0x1ed   :  { %1259 = vmatprep.subr.mxu1 %v1513_v0 }
 0x1ee   :  { %1260 = vmatpush3.msra.mxu1 %v1602_v12 }
 0x1ef   :  { %1261 = vmatprep.subr.mxu1 %v1513_v0 }
 0x1f0   :  { %1262 = vmatpush3.msra.mxu1 %v1608_v13 }
 0x1f1   :  { %1263 = vmatprep.subr.mxu1 %v1513_v0 }
 0x1f2   :  { %1264 = vmatpush3.msra.mxu1 %v1614_v14 }
 0x1f3   :  { %1265 = vmatprep.subr.mxu1 %v1513_v0 }
 0x1f4   :  { %1266 = vmatpush3.msra.mxu1 %v1620_v15 }
 0x1f5   :  { %1267 = vmatprep.subr.mxu1 %v1513_v0 }
 0x1f6   :  { %1268 = vmatpush3.msra.mxu1 %v1626_v16 }
 0x1f7   :  { %1269 = vmatprep.subr.mxu1 %v1513_v0 }
 0x1f8   :  { %1270 = vmatpush3.msra.mxu1 %v1632_v17 }
 0x1f9   :  { %1271 = vmatprep.subr.mxu1 %v1513_v0 }
 0x1fa   :  { %1272 = vmatpush3.msra.mxu1 %v1638_v18 }
 0x1fb   :  { %1273 = vmatprep.subr.mxu1 %v1513_v0 }
 0x1fc   :  { %1274 = vmatpush3.msra.mxu1 %v1644_v19 }
 0x1fd   :  { %1275 = vmatprep.subr.mxu1 %v1513_v0 }
 0x1fe   :  { %1276 = vmatpush3.msra.mxu1 %v1650_v20 }
 0x1ff   :  { %1315 = vmatprep.subr.mxu1 %v1513_v0 }
 0x29f   :  { %v436_v47 = vpop.f32.mrf.mxu1 }
 0x2a0   :  { %v437_v48 = vadd.f32 %v436_v47, %v171_v46 }
 0x2a1   :  { %v1209_v49 = vpop.f32.mrf.mxu1 }
 0x2a2   :  { %1431 = vtanh.f32 %v437_v48 }
 0x2af   :  { %v1432_v50 = vpop.eup %1431 }
 0x2b0   :  { %1243 = vmatmul.mubr.f32.vlgmr.msra.gmra.mxu0 %v1432_v50 }
 0x2b1   :  { %1281 = vmatpush3.msra.mxu0 %v1560_v1  ;;  %1312 = vmatprep.mubr.msk.f32.mxu0 %vm1514_vm0, %v1513_v0 }
 0x2b2   :  { %1282 = vmatprep.subr.mxu0 %v1513_v0 }
 0x2b3   :  { %1283 = vmatpush3.msra.mxu0 %v1562_v2 }
 0x2b4   :  { %1284 = vmatprep.subr.mxu0 %v1513_v0 }
 0x2b5   :  { %1285 = vmatpush3.msra.mxu0 %v1566_v3 }
 0x2b6   :  { %1286 = vmatprep.subr.mxu0 %v1513_v0 }
 0x2b7   :  { %1287 = vmatpush3.msra.mxu0 %v1573_v5 }
 0x2b8   :  { %1288 = vmatprep.subr.mxu0 %v1513_v0 }
 0x2b9   :  { %1289 = vmatpush3.msra.mxu0 %v1583_v8 }
 0x2ba   :  { %1290 = vmatprep.subr.mxu0 %v1513_v0 }
 0x2bb   :  { %1291 = vmatpush3.msra.mxu0 %v1590_v10 }
 0x2bc   :  { %1292 = vmatprep.subr.mxu0 %v1513_v0 }
 0x2bd   :  { %1293 = vmatpush3.msra.mxu0 %v1596_v11 }
 0x2be   :  { %1294 = vmatprep.subr.mxu0 %v1513_v0 }
 0x2bf   :  { %1295 = vmatpush3.msra.mxu0 %v1602_v12 }
 0x2c0   :  { %1296 = vmatprep.subr.mxu0 %v1513_v0 }
 0x2c1   :  { %1297 = vmatpush3.msra.mxu0 %v1608_v13 }
 0x2c2   :  { %1298 = vmatprep.subr.mxu0 %v1513_v0 }
 0x2c3   :  { %1299 = vmatpush3.msra.mxu0 %v1614_v14 }
 0x2c4   :  { %1300 = vmatprep.subr.mxu0 %v1513_v0 }
 0x2c5   :  { %1301 = vmatpush3.msra.mxu0 %v1620_v15 }
 0x2c6   :  { %1302 = vmatprep.subr.mxu0 %v1513_v0 }
 0x2c7   :  { %1303 = vmatpush3.msra.mxu0 %v1626_v16 }
 0x2c8   :  { %1304 = vmatprep.subr.mxu0 %v1513_v0 }
 0x2c9   :  { %1305 = vmatpush3.msra.mxu0 %v1632_v17 }
 0x2ca   :  { %1306 = vmatprep.subr.mxu0 %v1513_v0 }
 0x2cb   :  { %1307 = vmatpush3.msra.mxu0 %v1638_v18 }
 0x2cc   :  { %1308 = vmatprep.subr.mxu0 %v1513_v0 }
 0x2cd   :  { %1309 = vmatpush3.msra.mxu0 %v1644_v19 }
 0x2ce   :  { %1310 = vmatprep.subr.mxu0 %v1513_v0 }
 0x2cf   :  { %1311 = vmatpush3.msra.mxu0 %v1650_v20 }
 0x2d0   :  { %1350 = vmatprep.subr.mxu0 %v1513_v0 }
 0x370   :  { %v509_v52 = vpop.f32.mrf.mxu0 }
 0x371   :  { %v510_v53 = vadd.f32 %v509_v52, %v176_v51 }
 0x372   :  { %v1244_v54 = vpop.f32.mrf.mxu0 }
 0x373   :  { %1433 = vtanh.f32 %v510_v53 }
 0x380   :  { %v1434_v55 = vpop.eup %1433 }
 0x381   :  { %1278 = vmatmul.mubr.f32.vlgmr.msra.gmra.mxu1 %v1434_v55 }
 0x382   :  { %1316 = vmatpush3.msra.mxu1 %v1560_v1  ;;  %1347 = vmatprep.mubr.msk.f32.mxu1 %vm1514_vm0, %v1513_v0 }
 0x383   :  { %1317 = vmatprep.subr.mxu1 %v1513_v0 }
 0x384   :  { %1318 = vmatpush3.msra.mxu1 %v1562_v2 }
 0x385   :  { %1319 = vmatprep.subr.mxu1 %v1513_v0 }
 0x386   :  { %1320 = vmatpush3.msra.mxu1 %v1566_v3 }
 0x387   :  { %1321 = vmatprep.subr.mxu1 %v1513_v0 }
 0x388   :  { %1322 = vmatpush3.msra.mxu1 %v1573_v5 }
 0x389   :  { %1323 = vmatprep.subr.mxu1 %v1513_v0 }
 0x38a   :  { %1324 = vmatpush3.msra.mxu1 %v1583_v8 }
 0x38b   :  { %1325 = vmatprep.subr.mxu1 %v1513_v0 }
 0x38c   :  { %1326 = vmatpush3.msra.mxu1 %v1590_v10 }
 0x38d   :  { %1327 = vmatprep.subr.mxu1 %v1513_v0 }
 0x38e   :  { %1328 = vmatpush3.msra.mxu1 %v1596_v11 }
 0x38f   :  { %1329 = vmatprep.subr.mxu1 %v1513_v0 }
 0x390   :  { %1330 = vmatpush3.msra.mxu1 %v1602_v12 }
 0x391   :  { %1331 = vmatprep.subr.mxu1 %v1513_v0 }
 0x392   :  { %1332 = vmatpush3.msra.mxu1 %v1608_v13 }
 0x393   :  { %1333 = vmatprep.subr.mxu1 %v1513_v0 }
 0x394   :  { %1334 = vmatpush3.msra.mxu1 %v1614_v14 }
 0x395   :  { %1335 = vmatprep.subr.mxu1 %v1513_v0 }
 0x396   :  { %1336 = vmatpush3.msra.mxu1 %v1620_v15 }
 0x397   :  { %1337 = vmatprep.subr.mxu1 %v1513_v0 }
 0x398   :  { %1338 = vmatpush3.msra.mxu1 %v1626_v16 }
 0x399   :  { %1339 = vmatprep.subr.mxu1 %v1513_v0 }
 0x39a   :  { %1340 = vmatpush3.msra.mxu1 %v1632_v17 }
 0x39b   :  { %1341 = vmatprep.subr.mxu1 %v1513_v0 }
 0x39c   :  { %1342 = vmatpush3.msra.mxu1 %v1638_v18 }
 0x39d   :  { %1343 = vmatprep.subr.mxu1 %v1513_v0 }
 0x39e   :  { %1344 = vmatpush3.msra.mxu1 %v1644_v19 }
 0x39f   :  { %1345 = vmatprep.subr.mxu1 %v1513_v0 }
 0x3a0   :  { %1346 = vmatpush3.msra.mxu1 %v1650_v20 }
 0x3a1   :  { %1385 = vmatprep.subr.mxu1 %v1513_v0 }
 0x441   :  { %v582_v57 = vpop.f32.mrf.mxu1 }
 0x442   :  { %v583_v58 = vadd.f32 %v582_v57, %v181_v56 }
 0x443   :  { %v1279_v59 = vpop.f32.mrf.mxu1 }
 0x444   :  { %1435 = vtanh.f32 %v583_v58 }
 0x451   :  { %v1436_v60 = vpop.eup %1435 }
 0x452   :  { %1313 = vmatmul.mubr.f32.vlgmr.msra.gmra.mxu0 %v1436_v60 }
 0x453   :  { %1351 = vmatpush3.msra.mxu0 %v1560_v1  ;;  %1382 = vmatprep.mubr.msk.f32.mxu0 %vm1514_vm0, %v1513_v0 }
 0x454   :  { %1352 = vmatprep.subr.mxu0 %v1513_v0 }
 0x455   :  { %1353 = vmatpush3.msra.mxu0 %v1562_v2 }
 0x456   :  { %1354 = vmatprep.subr.mxu0 %v1513_v0 }
 0x457   :  { %1355 = vmatpush3.msra.mxu0 %v1566_v3  ;;  %v821_v3 = vld [vmem:[#allocation6 + $0x78] sm:$0xff] }
 0x458   :  { %1356 = vmatprep.subr.mxu0 %v1513_v0 }
 0x459   :  { %1357 = vmatpush3.msra.mxu0 %v1573_v5  ;;  %v819_v5 = vld [vmem:[#allocation6 + $0x68] sm:$0xff] }
 0x45a   :  { %1358 = vmatprep.subr.mxu0 %v1513_v0 }
 0x45b   :  { %1359 = vmatpush3.msra.mxu0 %v1583_v8  ;;  %v816_v8 = vld [vmem:[#allocation6 + $0x50] sm:$0xff] }
 0x45c   :  { %1360 = vmatprep.subr.mxu0 %v1513_v0 }
 0x45d   :  { %1361 = vmatpush3.msra.mxu0 %v1590_v10  ;;  %v191_v10 = vadd.f32 %v1735_v28, %v1780_v40 }
 0x45e   :  { %1362 = vmatprep.subr.mxu0 %v1513_v0 }
 0x45f   :  { %1363 = vmatpush3.msra.mxu0 %v1596_v11 }
 0x460   :  { %1364 = vmatprep.subr.mxu0 %v1513_v0 }
 0x461   :  { %1365 = vmatpush3.msra.mxu0 %v1602_v12 }
 0x462   :  { %1366 = vmatprep.subr.mxu0 %v1513_v0 }
 0x463   :  { %1367 = vmatpush3.msra.mxu0 %v1608_v13 }
 0x464   :  { %1368 = vmatprep.subr.mxu0 %v1513_v0 }
 0x465   :  { %1369 = vmatpush3.msra.mxu0 %v1614_v14 }
 0x466   :  { %1370 = vmatprep.subr.mxu0 %v1513_v0 }
 0x467   :  { %1371 = vmatpush3.msra.mxu0 %v1620_v15  ;;  %v814_v15 = vld [vmem:[#allocation6 + $0x40] sm:$0xff] }
 0x468   :  { %1372 = vmatprep.subr.mxu0 %v1513_v0 }
 0x469   :  { %1373 = vmatpush3.msra.mxu0 %v1626_v16  ;;  %v813_v16 = vld [vmem:[#allocation6 + $0x38] sm:$0xff] }
 0x46a   :  { %1374 = vmatprep.subr.mxu0 %v1513_v0 }
 0x46b   :  { %1375 = vmatpush3.msra.mxu0 %v1632_v17  ;;  %v812_v17 = vld [vmem:[#allocation6 + $0x30] sm:$0xff] }
 0x46c   :  { %1376 = vmatprep.subr.mxu0 %v1513_v0 }
 0x46d   :  { %1377 = vmatpush3.msra.mxu0 %v1638_v18  ;;  %v811_v18 = vld [vmem:[#allocation6 + $0x28] sm:$0xff] }
 0x46e   :  { %1378 = vmatprep.subr.mxu0 %v1513_v0 }
 0x46f   :  { %1379 = vmatpush3.msra.mxu0 %v1644_v19  ;;  %v810_v19 = vld [vmem:[#allocation6 + $0x20] sm:$0xff] }
 0x470   :  { %1380 = vmatprep.subr.mxu0 %v1513_v0 }
 0x471   :  { %1381 = vmatpush3.msra.mxu0 %v1650_v20  ;;  %v809_v20 = vld [vmem:[#allocation6 + $0x18] sm:$0xff] }
 0x512   :  { %v655_v62 = vpop.f32.mrf.mxu0 }
 0x513   :  { %v656_v63 = vadd.f32 %v655_v62, %v186_v61 }
 0x514   :  { %v1314_v1 = vpop.f32.mrf.mxu0 }
 0x515   :  { %1437 = vtanh.f32 %v656_v63 }
 0x522   :  { %v1438_v2 = vpop.eup %1437 }
 0x523   :  { %1348 = vmatmul.mubr.f32.vlgmr.msra.gmra.mxu1 %v1438_v2 }
 0x524   :  { %1417 = vmatprep.mubr.msk.f32.mxu1 %vm1514_vm0, %v1513_v0  ;;  %1386 = vmatpush3.msra.mxu1 %v821_v3 }
 0x525   :  { %1387 = vmatprep.subr.mxu1 %v1513_v0 }
 0x526   :  { %1388 = vmatpush3.msra.mxu1 %v820_v4 }
 0x527   :  { %1389 = vmatprep.subr.mxu1 %v1513_v0 }
 0x528   :  { %1390 = vmatpush3.msra.mxu1 %v819_v5 }
 0x529   :  { %1391 = vmatprep.subr.mxu1 %v1513_v0 }
 0x52a   :  { %1392 = vmatpush3.msra.mxu1 %v818_v6 }
 0x52b   :  { %1393 = vmatprep.subr.mxu1 %v1513_v0 }
 0x52c   :  { %1394 = vmatpush3.msra.mxu1 %v817_v7 }
 0x52d   :  { %1395 = vmatprep.subr.mxu1 %v1513_v0 }
 0x52e   :  { %1396 = vmatpush3.msra.mxu1 %v816_v8 }
 0x52f   :  { %1397 = vmatprep.subr.mxu1 %v1513_v0 }
 0x530   :  { %1398 = vmatpush3.msra.mxu1 %v815_v9 }
 0x531   :  { %1399 = vmatprep.subr.mxu1 %v1513_v0 }
 0x532   :  { %1400 = vmatpush3.msra.mxu1 %v814_v15 }
 0x533   :  { %1401 = vmatprep.subr.mxu1 %v1513_v0 }
 0x534   :  { %1402 = vmatpush3.msra.mxu1 %v813_v16 }
 0x535   :  { %1403 = vmatprep.subr.mxu1 %v1513_v0 }
 0x536   :  { %1404 = vmatpush3.msra.mxu1 %v812_v17 }
 0x537   :  { %1405 = vmatprep.subr.mxu1 %v1513_v0 }
 0x538   :  { %1406 = vmatpush3.msra.mxu1 %v811_v18 }
 0x539   :  { %1407 = vmatprep.subr.mxu1 %v1513_v0 }
 0x53a   :  { %1408 = vmatpush3.msra.mxu1 %v810_v19 }
 0x53b   :  { %1409 = vmatprep.subr.mxu1 %v1513_v0 }
 0x53c   :  { %1410 = vmatpush3.msra.mxu1 %v809_v20 }
 0x53d   :  { %1411 = vmatprep.subr.mxu1 %v1513_v0 }
 0x53e   :  { %1412 = vmatpush3.msra.mxu1 %v808_v21 }
 0x53f   :  { %1413 = vmatprep.subr.mxu1 %v1513_v0 }
 0x540   :  { %1414 = vmatpush3.msra.mxu1 %v807_v22 }
 0x541   :  { %1415 = vmatprep.subr.mxu1 %v1513_v0 }
 0x542   :  { %1416 = vmatpush3.msra.mxu1 %v806_v23 }
 0x5e3   :  { %v728_v11 = vpop.f32.mrf.mxu1 }
 0x5e4   :  { %v729_v12 = vadd.f32 %v728_v11, %v191_v10 }
 0x5e5   :  { %v1349_v13 = vpop.f32.mrf.mxu1 }
 0x5e6   :  { %1439 = vtanh.f32 %v729_v12 }
 0x5f3   :  { %v1440_v14 = vpop.eup %1439 }
 0x5f4   :  { %1383 = vmatmul.mubr.f32.vlgmr.msra.gmra.mxu0 %v1440_v14 }
 0x6b4   :  { %v801_v25 = vpop.f32.mrf.mxu0 }
 0x6b5   :  { %v802_v26 = vadd.f32 %v801_v25, %v196_v24 }
 0x6b6   :  { %v1384_v27 = vpop.f32.mrf.mxu0 }
 0x6b7   :  { %1441 = vtanh.f32 %v802_v26 }
 0x6c4   :  { %v1442_v29 = vpop.eup %1441 }
 0x6c5   :  { %1418 = vmatmul.mubr.f32.vlgmr.msra.gmra.mxu1 %v1442_v29 }
 0x785   :  { %v895_v31 = vpop.f32.mrf.mxu1 }
 0x786   :  { %v896_v32 = vadd.f32 %v925_v30, %v895_v31 }
 0x787   :  { %v1419_v0 = vpop.f32.mrf.mxu1 }
 0x788   :  { %899 = vst [vmem:[#allocation8] sm:$0xff] %v896_v32 }
 0x789   :  { %1494 = shalt.err (!%p1491_p0)
}
 0x78a   :  { %909 = dma.vmem_to_hbm [thread:$0]  %s907_s29, 128, %s1958_s6, [#allocation5]  }
 0x78b   :  { %1507 = dma.done.wait [#allocation5], 128  }
 0x78c   :  { %1508 = vsyncadd [#allocation5], 4294967168 }
 0x78d   :  { %913 = vsyncpa [#allocation4], 1 }
 0x78e   :  { %914 = vsyncpa [#allocation7], 1 }
 0x78f   :  { %915 = vsyncpa [#allocation5], 1 }

</bundles_post_ra>
